<compile_context>
chip_gen: v5e
topology: v5e:2x2
jax: 0.10.0
libtpu: 0.0.40
codegen_flags: <defaults>
</compile_context>

<pallas_src>
import jax
import jax.numpy as jnp
from jax.experimental import pallas as pl
from jax.experimental.pallas import tpu as pltpu


def _round_up(x, m):
    return ((x + m - 1) // m) * m


def _pick_vocab_tile(vocab, desired):
    """Largest 128-multiple tile that divides vocab and is <= desired."""
    if vocab % 128 != 0:
        return vocab  # last-dim block must be a 128-multiple or the full dim
    for cand in (desired, 2048, 1024, 512, 256, 128):
        if cand is None:
            continue
        if cand % 128 == 0 and cand <= vocab and vocab % cand == 0:
            return cand
    return vocab


def generator_kernel(x_ref, w_ref, b_ref, o_ref, logits_ref):
    """Grid = (row tiles, vocab tiles).

    Each step computes one (row_tile, vocab_tile) panel of logits on the MXU
    and stores it into the f32 logits scratch.  On the last vocab step the
    full-row log_softmax is computed once and written to the output block
    (which is resident across the vocab axis).
    """
    j = pl.program_id(1)
    nj = pl.num_programs(1)
    vt = w_ref.shape[1]  # static vocab tile width

    # MXU matmul with f32 accumulation; bias already f32 (cast hoisted out).
    part = jnp.dot(x_ref[...], w_ref[...], preferred_element_type=jnp.float32)
    part = part + b_ref[...]

    col = pl.multiple_of(j * vt, vt)
    logits_ref[:, pl.ds(col, vt)] = part

    @pl.when(j == nj - 1)
    def _finalize():
        logits = logits_ref[...]
        m = jnp.max(logits, axis=-1, keepdims=True)
        shifted = logits - m
        lse = jnp.log(jnp.sum(jnp.exp(shifted), axis=-1, keepdims=True))
        o_ref[...] = (shifted - lse).astype(o_ref.dtype)


def generator_forward(x, w, b, *, row_tile=128, vocab_tile=512,
                      matmul_dtype=None):
    """x: [batch, seq, d_model]; w: [d_model, vocab]; b: [vocab].

    matmul_dtype: optional dtype (e.g. jnp.bfloat16) for the matmul operands;
    softmax math is always f32 and the output keeps x's dtype.
    """
    batch, seq, d_model = x.shape
    vocab = w.shape[1]
    out_dtype = x.dtype
    rows = batch * seq

    cdtype = jnp.dtype(matmul_dtype) if matmul_dtype is not None else jnp.dtype(x.dtype)
    x2d = x.reshape(rows, d_model).astype(cdtype)
    w_c = w.astype(cdtype)
    b2d = b.reshape(1, vocab).astype(jnp.float32)  # hoisted bias cast

    # Sublane packing: 16 rows/vreg for 16-bit dtypes, 8 for 32-bit.
    sub = 16 if cdtype.itemsize < 4 else 8
    rt = min(row_tile, _round_up(rows, sub))
    rt = _round_up(rt, sub)
    rows_p = _round_up(rows, rt)
    if rows_p != rows:
        # Masked tail handled by padding; padded rows give finite log_softmax
        # values (logits == bias) and are sliced off below.
        x2d = jnp.pad(x2d, ((0, rows_p - rows), (0, 0)))

    vt = _pick_vocab_tile(vocab, vocab_tile)
    n_i = rows_p // rt
    n_j = vocab // vt

    # Explicit VMEM budget: double-buffered pipeline inputs + revisited output
    # block + f32 logits scratch (keeps large configs inside v7x's 64 MiB).
    xb = cdtype.itemsize
    ob = jnp.dtype(out_dtype).itemsize
    est = (2 * rt * d_model * xb        # x tiles (double-buffered)
           + 2 * d_model * vt * xb      # streamed weight tiles (double-buffered)
           + 2 * vt * 4                 # bias tiles
           + 2 * rt * vocab * ob        # output block
           + rt * vocab * 4)            # logits scratch
    vmem_limit = int(min(128 * 1024 * 1024,
                         max(32 * 1024 * 1024, int(1.5 * est))))

    out2d = pl.pallas_call(
        generator_kernel,
        out_shape=jax.ShapeDtypeStruct((rows_p, vocab), out_dtype),
        grid_spec=pltpu.PrefetchScalarGridSpec(
            num_scalar_prefetch=0,
            grid=(n_i, n_j),
            in_specs=[
                pl.BlockSpec((rt, d_model), lambda i, j: (i, 0)),
                pl.BlockSpec((d_model, vt), lambda i, j: (0, j)),
                pl.BlockSpec((1, vt), lambda i, j: (0, j)),
            ],
            out_specs=pl.BlockSpec((rt, vocab), lambda i, j: (i, 0)),
            scratch_shapes=[pltpu.VMEM((rt, vocab), jnp.float32)],
        ),
        compiler_params=pltpu.CompilerParams(
            dimension_semantics=("parallel", "arbitrary"),
            vmem_limit_bytes=vmem_limit,
        ),
    )(x2d, w_c, b2d)

    if rows_p != rows:
        out2d = out2d[:rows]
    return out2d.reshape(batch, seq, vocab)


if __name__ == "__main__":
    # Small shapes consistent with the module's forward.
    batch, seq, d_model, vocab = 2, 8, 32, 128

    key = jax.random.PRNGKey(0)
    kx, kw, kb = jax.random.split(key, 3)

    x = jax.random.normal(kx, (batch, seq, d_model), dtype=jnp.float32)
    # Deterministic nn.Linear-like uniform init with bound 1/sqrt(d_model).
    bound = 1.0 / (d_model ** 0.5)
    w = jax.random.uniform(kw, (d_model, vocab), jnp.float32, -bound, bound)
    b = jax.random.uniform(kb, (vocab,), jnp.float32, -bound, bound)

    ref = jax.nn.log_softmax(jnp.einsum("bsd,dv->bsv", x, w) + b, axis=-1)

    # f32 matmul path (exact check).
    out = generator_forward(x, w, b)
    jax.block_until_ready(out)
    assert out.shape == (batch, seq, vocab)
    assert jnp.allclose(out, ref, atol=1e-5, rtol=1e-5)

    # bf16 matmul path (MXU-peak config on v5e/v6e/v7x; looser tolerance).
    out_bf16 = generator_forward(x, w, b, matmul_dtype=jnp.bfloat16)
    jax.block_until_ready(out_bf16)
    assert out_bf16.shape == (batch, seq, vocab)
    assert jnp.allclose(out_bf16, ref, atol=5e-2, rtol=5e-2)

    print("KERNEL_OK")
</pallas_src>

<mosaic_0001>
module attributes {stable_mosaic.version = 11 : i64} {
  func.func @generator_kernel(%arg0: i32, %arg1: i32, %arg2: memref<16x32xf32, #tpu.memory_space<vmem>>, %arg3: memref<32x128xf32, #tpu.memory_space<vmem>>, %arg4: memref<1x128xf32, #tpu.memory_space<vmem>>, %arg5: memref<16x128xf32, #tpu.memory_space<vmem>>, %arg6: memref<16x128xf32, #tpu.memory_space<vmem>>) attributes {dimension_semantics = [#tpu.dimension_semantics<parallel>, #tpu.dimension_semantics<arbitrary>], iteration_bounds = array<i64: 1, 1>, scalar_prefetch = 0 : i64, scratch_operands = 1 : i64, tpu.core_type = #tpu.core_type<tc>, window_params = [{transform_indices = @transform_0, window_bounds = array<i64: 16, 32>}, {transform_indices = @transform_1, window_bounds = array<i64: 32, 128>}, {transform_indices = @transform_2, window_bounds = array<i64: 1, 128>}, {transform_indices = @transform_3, window_bounds = array<i64: 16, 128>}]} {
    %c0 = arith.constant 0 : index
    %c0_0 = arith.constant 0 : index
    %0 = vector.load %arg2[%c0, %c0_0] : memref<16x32xf32, #tpu.memory_space<vmem>>, vector<16x32xf32>
    %c0_1 = arith.constant 0 : index
    %c0_2 = arith.constant 0 : index
    %1 = vector.load %arg3[%c0_1, %c0_2] : memref<32x128xf32, #tpu.memory_space<vmem>>, vector<32x128xf32>
    %cst = arith.constant dense<0.000000e+00> : vector<16x128xf32>
    %2 = tpu.matmul %0, %1, %cst {dimension_numbers = #tpu.dot_dimension_numbers<[1], [0], [0], [1], [0, 0, 1, 1], [], []>} : vector<16x32xf32>, vector<32x128xf32>, vector<16x128xf32> -> vector<16x128xf32>
    %c0_3 = arith.constant 0 : index
    %c0_4 = arith.constant 0 : index
    %3 = vector.load %arg4[%c0_3, %c0_4] : memref<1x128xf32, #tpu.memory_space<vmem>>, vector<1x128xf32>
    %4 = vector.broadcast %3 : vector<1x128xf32> to vector<16x128xf32>
    %5 = arith.addf %2, %4 : vector<16x128xf32>
    %c128_i32 = arith.constant 128 : i32
    %6 = arith.muli %arg1, %c128_i32 : i32
    %7 = tpu.assume_multiple %6, 128 : i32
    %c0_5 = arith.constant 0 : index
    %8 = arith.index_cast %7 : i32 to index
    %9 = vector.load %arg6[%c0_5, %8] : memref<16x128xf32, #tpu.memory_space<vmem>>, vector<16x128xf32>
    tpu.vector_store %arg6[%c0_5, %8], %5 {strides = array<i32>} : memref<16x128xf32, #tpu.memory_space<vmem>>, vector<16x128xf32>,
    %c0_i32 = arith.constant 0 : i32
    %10 = arith.cmpi eq, %arg1, %c0_i32 : i32
    %11 = arith.extui %10 : i1 to i32
    %c0_i32_6 = arith.constant 0 : i32
    %12 = arith.cmpi ne, %11, %c0_i32_6 : i32
    scf.if %12 {
      %c0_7 = arith.constant 0 : index
      %c0_8 = arith.constant 0 : index
      %13 = vector.load %arg6[%c0_7, %c0_8] : memref<16x128xf32, #tpu.memory_space<vmem>>, vector<16x128xf32>
      %cst_9 = arith.constant dense<0xFF800000> : vector<16xf32>
      %14 = vector.multi_reduction <maximumf>, %13, %cst_9 [1] : vector<16x128xf32> to vector<16xf32>
      %15 = vector.shape_cast %14 : vector<16xf32> to vector<16x1xf32>
      %16 = vector.broadcast %15 : vector<16x1xf32> to vector<16x128xf32>
      %17 = arith.subf %13, %16 : vector<16x128xf32>
      %18 = math.exp %17 : vector<16x128xf32>
      %cst_10 = arith.constant dense<0.000000e+00> : vector<16xf32>
      %19 = vector.multi_reduction <add>, %18, %cst_10 [1] : vector<16x128xf32> to vector<16xf32>
      %20 = vector.shape_cast %19 : vector<16xf32> to vector<16x1xf32>
      %21 = math.log %20 : vector<16x1xf32>
      %22 = vector.broadcast %21 : vector<16x1xf32> to vector<16x128xf32>
      %23 = arith.subf %17, %22 : vector<16x128xf32>
      %c0_11 = arith.constant 0 : index
      %c0_12 = arith.constant 0 : index
      %24 = vector.load %arg5[%c0_11, %c0_12] : memref<16x128xf32, #tpu.memory_space<vmem>>, vector<16x128xf32>
      tpu.vector_store %arg5[%c0_11, %c0_12], %23 {strides = array<i32>} : memref<16x128xf32, #tpu.memory_space<vmem>>, vector<16x128xf32>,
    } else {
    }
    return
  }
  func.func @transform_0(%arg0: i32, %arg1: i32) -> (i32, i32) {
    %c0_i32 = arith.constant 0 : i32
    %c0_i32_0 = arith.constant 0 : i32
    return %arg0, %c0_i32 : i32, i32
  }
  func.func @transform_1(%arg0: i32, %arg1: i32) -> (i32, i32) {
    %c0_i32 = arith.constant 0 : i32
    %c0_i32_0 = arith.constant 0 : i32
    return %c0_i32, %arg1 : i32, i32
  }
  func.func @transform_2(%arg0: i32, %arg1: i32) -> (i32, i32) {
    %c0_i32 = arith.constant 0 : i32
    %c0_i32_0 = arith.constant 0 : i32
    return %c0_i32, %arg1 : i32, i32
  }
  func.func @transform_3(%arg0: i32, %arg1: i32) -> (i32, i32) {
    %c0_i32 = arith.constant 0 : i32
    %c0_i32_0 = arith.constant 0 : i32
    return %arg0, %c0_i32 : i32, i32
  }
}

</mosaic_0001>

<bundles_post_ra>
// kernel: tpu_custom_call.1
= control target key start
LH: loop header
LB: loop body
LE: loop exit
PB: predicated region body
PF: predicated region fallthrough
CT: control target
= control target key end

     0   :  { %8 = vsyncpa [#allocation4], 0  ;;  %s286_s0 = inlined_call_operand.hbm [shape: f32[16,32], index: 0, kind: input, shape index: {}]   ;;  %s287_s1 = inlined_call_operand.hbm [shape: f32[32,128], index: 1, kind: input, shape index: {}]   ;;  %s288_s2 = inlined_call_operand.vmem [shape: f32[1,128], index: 2, kind: input, shape index: {}]   ;;  %s289_s3 = inlined_call_operand.hbm [shape: f32[16,128], index: 3, kind: output, shape index: {}]  }
   0x1   :  { %9 = vsyncpa [#allocation7], 0 }
   0x2   :  { %10 = vsyncpa [#allocation5], 0  ;;  %s15_s14 = sshll.u32 %s286_s0, 4  ;;  %s240_s15 = smov [#allocation3]   ;;  %s16_s14 = int_to_ptr.hbm [resolvable:$true] %s15_s14 }
   0x3   :  { %s17_s16 = sshll.u32 %s240_s15, 4  ;;  %s28_s19 = sshll.u32 %s287_s1, 4  ;;  %s18_s16 = int_to_ptr.vmem [resolvable:$true] %s17_s16  ;;  %s29_s19 = int_to_ptr.hbm [resolvable:$true] %s28_s19 }
   0x4   :  { %s241_s20 = smov 128   ;;  %s242_s21 = smov 8  }
   0x5   :  { %23 = dma.hbm_to_vmem [thread:$0]  %s16_s14, 256, %s18_s16, [#allocation4], %s241_s20, %s241_s20, %s242_s21  }
   0x6   :  { %s243_s22 = smov [#allocation6]  }
   0x7   :  { %s30_s23 = sshll.u32 %s243_s22, 4  ;;  %s31_s23 = int_to_ptr.vmem [resolvable:$true] %s30_s23 }
   0x8   :  { %36 = dma.hbm_to_vmem [thread:$0]  %s29_s19, 512, %s31_s23, [#allocation7], %s241_s20, %s241_s20, %s242_s21  }
   0x9   :  { %234 = dma.done.wait [#allocation4], 256  }
   0xa   :  { %235 = vsyncadd [#allocation4], 4294967040 }
   0xb   :  { %236 = dma.done.wait [#allocation7], 512  }
   0xc   :  { %237 = vsyncadd [#allocation7], 4294966784  ;;  %v52_v0 = vld [vmem:[#allocation6 + $0x18] sm:$0xff]  ;;  %v51_v1 = vld [vmem:[#allocation6 + $0x10] sm:$0xff]  ;;  %vm57_vm0 = vcmask 261120   ;;  %s127_s27 = sshll.u32 %s289_s3, 4  ;;  %s128_s27 = int_to_ptr.hbm [resolvable:$true] %s127_s27 }
   0xd   :  { %76 = vmatpush.msra.mxu0 %v52_v0  ;;  %144 = vmatpush.msra.mxu1 %v52_v0  ;;  %v50_v2 = vld [vmem:[#allocation6 + $0x8] sm:$0xff]  ;;  %v49_v3 = vld [vmem:[#allocation6] sm:$0xff]  ;;  %v47_v4 = vld [vmem:[#allocation3] sm:$0xff] }
   0xe   :  { %v48_v5 = vld [vmem:[#allocation3 + $0x8] sm:$0xff]  ;;  %v153_v6 = vld [vmem:[%s288_s2] ss:$0 sm:$0xff]  ;;  %s244_s2 = smov [#allocation8]  }
   0xf   :  { %77 = vmatpush.msra.mxu0 %v51_v1  ;;  %145 = vmatpush.msra.mxu1 %v51_v1  ;;  %s125_s24 = sshll.u32 %s244_s2, 4  ;;  %s126_s24 = int_to_ptr.vmem [resolvable:$true] %s125_s24 }
  0x11   :  { %78 = vmatpush.msra.mxu0 %v50_v2  ;;  %146 = vmatpush.msra.mxu1 %v50_v2 }
  0x13   :  { %79 = vmatpush.msra.mxu0 %v49_v3  ;;  %147 = vmatpush.msra.mxu1 %v49_v3 }
  0x14   :  { %142 = vmatmul.msk.f32.vlgmr.msra.gmra.mxu0 %vm57_vm0, %v47_v4  ;;  %143 = vmatmul.msk.f32.vlgmr.msra.gmra.mxu1 %vm57_vm0, %v48_v5 }
  0x91   :  { %v81_v7 = vpop.f32.mrf.mxu0  ;;  %v84_v9 = vpop.f32.mrf.mxu1 }
  0x92   :  { %v82_v8 = vadd.f32 %v153_v6, %v81_v7  ;;  %v85_v10 = vadd.f32 %v153_v6, %v84_v9 }
  0x94   :  { %99 = vmax.xlane.f32.xlu0 %v82_v8 }
  0x9c   :  { %101 = vmax.xlane.f32.xlu0 %v85_v10 }
 0x107   :  { %v100_v11 = vpop.xlane.xlu0 %99 }
 0x108   :  { %v103_v12 = vsub.f32 %v82_v8, %v100_v11 }
 0x10a   :  { %v105_v13 = vmul.f32 1.442695, %v103_v12 }
 0x10c   :  { %154 = vpow2.f32 %v105_v13 }
 0x10f   :  { %v102_v14 = vpop.xlane.xlu0 %101 }
 0x110   :  { %v104_v15 = vsub.f32 %v85_v10, %v102_v14 }
 0x112   :  { %v155_v16 = vpop.eup %154  ;;  %v107_v17 = vmul.f32 1.442695, %v104_v15 }
 0x113   :  { %109 = vadd.xlane.f32.xlu1 %v155_v16 }
 0x114   :  { %156 = vpow2.f32 %v107_v17 }
 0x11a   :  { %v157_v18 = vpop.eup %156 }
 0x11b   :  { %111 = vadd.xlane.f32.xlu1 %v157_v18 }
 0x186   :  { %v110_v19 = vpop.xlane.xlu1 %109 }
 0x187   :  { %158 = vlog2.f32 %v110_v19 }
 0x18d   :  { %v159_v20 = vpop.eup %158 }
 0x18e   :  { %v114_v21 = vmul.f32 0.6931472, %v159_v20  ;;  %v112_v22 = vpop.xlane.xlu1 %111 }
 0x18f   :  { %160 = vlog2.f32 %v112_v22 }
 0x190   :  { %v117_v23 = vsub.f32 %v103_v12, %v114_v21 }
 0x192   :  { %119 = vst [vmem:[#allocation8] sm:$0xff] %v117_v23 }
 0x195   :  { %v161_v24 = vpop.eup %160 }
 0x196   :  { %v116_v25 = vmul.f32 0.6931472, %v161_v24 }
 0x198   :  { %v118_v26 = vsub.f32 %v104_v15, %v116_v25 }
 0x19a   :  { %120 = vst [vmem:[#allocation8 + $0x8] sm:$0xff] %v118_v26 }
 0x19b   :  { %133 = dma.vmem_to_hbm [thread:$0]  %s126_s24, 256, %s128_s27, [#allocation5], %s241_s20, %s241_s20, %s242_s21  }
 0x19c   :  { %238 = dma.done.wait [#allocation5], 256  }
 0x19d   :  { %239 = vsyncadd [#allocation5], 4294967040 }
 0x19e   :  { %138 = vsyncpa [#allocation4], 1 }
 0x19f   :  { %139 = vsyncpa [#allocation7], 1 }
 0x1a0   :  { %140 = vsyncpa [#allocation5], 1 }

</bundles_post_ra>
